<compile_context>
chip_gen: v6e
topology: v6e:2x2x1
jax: 0.10.0
libtpu: 0.0.40
codegen_flags: <defaults>
</compile_context>

<pallas_src>
import jax
import jax.numpy as jnp
from jax.experimental import pallas as pl
from jax.experimental.pallas import tpu as pltpu

INPUT_DIM = 4
OUTPUT_DIM = 1

LANES = 128              # vreg lane width; the batch lives on this axis
MIN_BLOCK_BATCH = 8192   # keep per-step DMA >> ~0.35us grid-step overhead
MAX_BLOCK_BATCH = 65536  # ~8 MiB double-buffered VMEM -> fits v5e's 16 MiB default
TARGET_BLOCKS = 8        # >= 2x TensorCores on v7x; enough steps to pipeline
MIN_PALLAS_BATCH = 1024  # below this a single fused XLA dot is strictly faster


def _round_up(v, m):
    return ((v + m - 1) // m) * m


def _pick_block_batch(batch):
    """Largest lane-multiple batch tile that amortizes per-step overhead while
    staying inside every generation's default scoped-VMEM budget."""
    lanes = _round_up(batch, LANES)
    if lanes <= MIN_BLOCK_BATCH:
        return lanes
    tile = (lanes // (TARGET_BLOCKS * LANES)) * LANES
    return int(min(MAX_BLOCK_BATCH, max(MIN_BLOCK_BATCH, tile)))


def linear_kernel(w_ref, b_ref, x_ref, o_ref):
    # w_ref: (in_dim, out_dim) f32 VMEM, resident across the whole grid (index_map -> (0,0))
    # b_ref: (out_dim,)        f32 SMEM scalars
    # x_ref: (in_dim, TB)      f32 VMEM, batch on the 128-lane axis (lane-dense)
    # o_ref: (out_dim, TB)     VMEM, batch on the lane axis (lane-dense stores)
    x = x_ref[...]                                   # one lane-dense load
    out_dim = o_ref.shape[0]
    for o in range(out_dim):                         # static unroll (out_dim == 1 here)
        w_col = w_ref[:, o:o + 1]                    # (in_dim, 1)
        # Full-height VPU multiply + sublane (XLU) reduction: ~4x fewer VALU ops than
        # per-row FMAs, keeps the kernel memory-bound on v7x. Exact f32 arithmetic.
        y = jnp.sum(x * w_col, axis=0, keepdims=True) + b_ref[o]
        o_ref[o:o + 1, :] = y.astype(o_ref.dtype)


def simple_model_forward(x, weight, bias, *, block_batch=None, use_pallas=None):
    """y = x @ weight.T + bias  (torch.nn.Linear forward semantics)."""
    batch, in_dim = x.shape
    out_dim = weight.shape[0]

    if use_pallas is None:
        use_pallas = batch >= MIN_PALLAS_BATCH
    if not use_pallas:
        # Tiny batches: a single fused XLA op beats kernel-launch / staging overhead.
        y = jnp.dot(x.astype(jnp.float32), jnp.transpose(weight).astype(jnp.float32),
                    precision=jax.lax.Precision.HIGHEST) + bias.astype(jnp.float32)
        return y.astype(x.dtype)

    tb = _pick_block_batch(batch) if block_batch is None else block_batch
    num_blocks = (batch + tb - 1) // tb   # ragged final block -> Pallas masks the stores

    # Feature-major staging so the batch sits on the 128-lane axis (dense vld/vst).
    # TODO(synk): produce x feature-major upstream to drop this extra HBM pass.
    x_fm = jnp.transpose(x).astype(jnp.float32)        # (in_dim, batch)
    w_fm = jnp.transpose(weight).astype(jnp.float32)   # (in_dim, out_dim)
    b_fm = bias.reshape(out_dim).astype(jnp.float32)   # (out_dim,)

    out_fm = pl.pallas_call(
        linear_kernel,
        out_shape=jax.ShapeDtypeStruct((out_dim, batch), x.dtype),
        grid_spec=pl.GridSpec(
            grid=(num_blocks,),
            in_specs=[
                pl.BlockSpec((in_dim, out_dim), lambda i: (0, 0)),   # weight, VMEM-resident
                pl.BlockSpec(memory_space=pltpu.MemorySpace.SMEM),   # bias scalars
                pl.BlockSpec((in_dim, tb), lambda i: (0, i)),        # lane-dense x tile
            ],
            out_specs=pl.BlockSpec((out_dim, tb), lambda i: (0, i)),
        ),
        compiler_params=pltpu.CompilerParams(
            dimension_semantics=("parallel",),        # shard batch tiles across TCs (v7x)
        ),
        cost_estimate=pl.CostEstimate(
            flops=2 * batch * in_dim * out_dim,
            bytes_accessed=4 * batch * (in_dim + out_dim) + 4 * out_dim * (in_dim + 1),
            transcendentals=0,
        ),
    )(w_fm, b_fm, x_fm)

    if out_dim == 1:
        return out_fm.reshape(batch, 1)   # (1, B) -> (B, 1) is a free bitcast
    return jnp.transpose(out_fm)


if __name__ == "__main__":
    key = jax.random.PRNGKey(0)
    kx, kw, kb = jax.random.split(key, 3)

    # Deterministic init mimicking nn.Linear's uniform(-1/sqrt(fan_in), 1/sqrt(fan_in)).
    bound = 1.0 / (INPUT_DIM ** 0.5)
    weight = jax.random.uniform(kw, (OUTPUT_DIM, INPUT_DIM), dtype=jnp.float32,
                                minval=-bound, maxval=bound)
    bias = jax.random.uniform(kb, (OUTPUT_DIM,), dtype=jnp.float32,
                              minval=-bound, maxval=bound)

    def reference(xv):
        # High-precision XLA reference (independent of default MXU matmul precision).
        return jnp.dot(xv, weight.T, precision=jax.lax.Precision.HIGHEST) + bias

    fwd = jax.jit(simple_model_forward, static_argnames=("block_batch", "use_pallas"))

    # Pallas path: tiny lane-padded batch, a ragged batch (exercises the masked
    # partial final block), and an exact lane-multiple batch.
    for batch in (8, 2053, 4096):
        xb = jax.random.normal(jax.random.fold_in(kx, batch), (batch, INPUT_DIM),
                               dtype=jnp.float32)
        y = jax.block_until_ready(fwd(xb, weight, bias, use_pallas=True))
        assert y.shape == (batch, OUTPUT_DIM)
        assert jnp.allclose(y, reference(xb), atol=1e-5, rtol=1e-5)

    # Auto-dispatch fast path for tiny batches (pure XLA, no kernel launch).
    x_small = jax.random.normal(kx, (8, INPUT_DIM), dtype=jnp.float32)
    y_small = jax.block_until_ready(fwd(x_small, weight, bias))
    assert y_small.shape == (8, OUTPUT_DIM)
    assert jnp.allclose(y_small, reference(x_small), atol=1e-5, rtol=1e-5)

    print("KERNEL_OK")
</pallas_src>

<mosaic_0001>
module attributes {stable_mosaic.version = 11 : i64} {
  func.func @linear_kernel(%arg0: i32, %arg1: memref<4x1xf32, #tpu.memory_space<vmem>>, %arg2: memref<1xf32, #tpu.memory_space<smem>>, %arg3: memref<4x128xf32, #tpu.memory_space<vmem>>, %arg4: memref<1x128xf32, #tpu.memory_space<vmem>>) attributes {dimension_semantics = [#tpu.dimension_semantics<parallel>], iteration_bounds = array<i64: 1>, scalar_prefetch = 0 : i64, scratch_operands = 0 : i64, tpu.core_type = #tpu.core_type<tc>, window_params = [{pipeline_mode = #tpu.pipeline_mode<synchronous>, transform_indices = @transform_0, window_bounds = array<i64: 4, 1>}, {transform_indices = @transform_1, window_bounds = array<i64: 1>}, {transform_indices = @transform_2, window_bounds = array<i64: 4, 128>}, {transform_indices = @transform_3, window_bounds = array<i64: 1, 128>}]} {
    %c0 = arith.constant 0 : index
    %c0_0 = arith.constant 0 : index
    %0 = vector.load %arg3[%c0, %c0_0] : memref<4x128xf32, #tpu.memory_space<vmem>>, vector<4x128xf32>
    %c0_1 = arith.constant 0 : index
    %c0_2 = arith.constant 0 : index
    %1 = vector.load %arg1[%c0_1, %c0_2] : memref<4x1xf32, #tpu.memory_space<vmem>>, vector<4x1xf32>
    %2 = vector.broadcast %1 : vector<4x1xf32> to vector<4x128xf32>
    %3 = arith.mulf %0, %2 : vector<4x128xf32>
    %cst = arith.constant dense<0.000000e+00> : vector<128xf32>
    %4 = vector.multi_reduction <add>, %3, %cst [0] : vector<4x128xf32> to vector<128xf32>
    %5 = vector.shape_cast %4 : vector<128xf32> to vector<1x128xf32>
    %c0_3 = arith.constant 0 : index
    %6 = memref.load %arg2[%c0_3] : memref<1xf32, #tpu.memory_space<smem>>
    %7 = vector.broadcast %6 : f32 to vector<1x128xf32>
    %8 = arith.addf %5, %7 : vector<1x128xf32>
    %c0_4 = arith.constant 0 : index
    %c0_5 = arith.constant 0 : index
    %9 = vector.load %arg4[%c0_4, %c0_5] : memref<1x128xf32, #tpu.memory_space<vmem>>, vector<1x128xf32>
    tpu.vector_store %arg4[%c0_4, %c0_5], %8 {strides = array<i32>} : memref<1x128xf32, #tpu.memory_space<vmem>>, vector<1x128xf32>,
    return
  }
  func.func @transform_0(%arg0: i32) -> (i32, i32) {
    %c0_i32 = arith.constant 0 : i32
    %c0_i32_0 = arith.constant 0 : i32
    %c0_i32_1 = arith.constant 0 : i32
    return %c0_i32, %c0_i32_0 : i32, i32
  }
  func.func @transform_1(%arg0: i32) -> i32 {
    %c0_i32 = arith.constant 0 : i32
    %c0_i32_0 = arith.constant 0 : i32
    return %c0_i32 : i32
  }
  func.func @transform_2(%arg0: i32) -> (i32, i32) {
    %c0_i32 = arith.constant 0 : i32
    %c0_i32_0 = arith.constant 0 : i32
    return %c0_i32, %arg0 : i32, i32
  }
  func.func @transform_3(%arg0: i32) -> (i32, i32) {
    %c0_i32 = arith.constant 0 : i32
    %c0_i32_0 = arith.constant 0 : i32
    return %c0_i32, %arg0 : i32, i32
  }
}

</mosaic_0001>

<bundles_post_ra>
// kernel: simple_model_forward.1
= control target key start
LH: loop header
LB: loop body
LE: loop exit
PB: predicated region body
PF: predicated region fallthrough
CT: control target
= control target key end

     0   :  { %v75_v1 = vmov 0   ;;  %s109_s0 = inlined_call_operand.vmem [shape: f32[4,1], index: 0, kind: input, shape index: {}]   ;;  %s110_s1 = inlined_call_operand.<no memory space> [shape: f32[1], index: 1, kind: input, shape index: {}]   ;;  %s111_s2 = inlined_call_operand.vmem [shape: f32[4,8], index: 2, kind: input, shape index: {}]   ;;  %s112_s3 = inlined_call_operand.hbm [shape: f32[1,8], index: 3, kind: output, shape index: {}]  }
   0x1   :  { %v17_v0 = vld [vmem:[%s109_s0] sm:$0xf]  ;;  %52 = vset.pattern.permute.xlu0 %v75_v1 }
   0x2   :  { %9 = vsyncpa [#allocation4], 0  ;;  %20 = vperm.xlu0 %52, %v17_v0   ;;  %v16_v2 = vld [vmem:[%s111_s2] sm:$0xf]  ;;  %vm24_vm0 = vcmask 1043456   ;;  %v33_v11 = vstv %s110_s1  ;;  %s76_s0 = smov [#allocation3]  }
   0x3   :  { %s42_s18 = sshll.u32 %s76_s0, 4  ;;  %s43_s18 = int_to_ptr.vmem [resolvable:$true] %s42_s18 }
   0x4   :  { %s53_s2 = scalar_lea.vmem %s43_s18, 16  ;;  %s57_s19 = scalar_lea.vmem %s43_s18, 32 }
   0x5   :  { %p54_p0 = scmp.ne.s32.totalorder %s43_s18, %s53_s2  ;;  %p58_p1 = scmp.lt.s32.totalorder %s43_s18, %s43_s18 }
   0x6   :  { %p59_p2 = scmp.lt.s32.totalorder %s57_s19, %s53_s2 }
   0x8   :  { %p60_p3 = por %p59_p2, %p58_p1 }
   0xa   :  { %p61_p4 = pnand %p60_p3, %p54_p0 }
  0x7d   :  { %v21_v3 = vpop.permute.xlu0 %20 }
  0x7e   :  { %v23_v4 = vmul.f32 %v21_v3, %v16_v2 }
  0x80   :  { %v25_v5 = vsel %vm24_vm0, %v23_v4, 0.0 }
  0x81   :  { %v26_v6 = vrot.slane %v25_v5, 4 }
  0x83   :  { %v27_v7 = vadd.f32 %v26_v6, %v25_v5 }
  0x85   :  { %v28_v8 = vrot.slane %v27_v7, 2 }
  0x87   :  { %v29_v9 = vadd.f32 %v28_v8, %v27_v7 }
  0x89   :  { %v30_v10 = vrot.slane %v29_v9, 1 }
  0x8b   :  { %v31_v12 = vadd.f32 %v30_v10, %v29_v9 }
  0x8d   :  { %v34_v13 = vadd.f32 %v33_v11, %v31_v12 }
  0x8f   :  { %35 = vst [vmem:[#allocation3] sm:$0x1] %v34_v13 }
  0x90   :  { %64 = shalt.err (!%p61_p4)
}
  0x91   :  { %45 = dma.vmem_to_hbm [thread:$0]  %s43_s18, 16, %s112_s3, [#allocation4]  }
  0x92   :  { %73 = dma.done.wait [#allocation4], 16  }
  0x93   :  { %74 = vsyncadd [#allocation4], 4294967280 }
  0x94   :  { %49 = vsyncpa [#allocation4], 1 }

</bundles_post_ra>
